<compile_context>
chip_gen: v6e
topology: v6e:2x2x1
jax: 0.10.0
libtpu: 0.0.40
codegen_flags: <defaults>
</compile_context>

<pallas_src>
import math
import functools

import jax
import jax.numpy as jnp
from jax.experimental import pallas as pl
from jax.experimental.pallas import tpu as pltpu


def _round_up(x, m):
    return -(-x // m) * m


# ----------------------------------------------------------------------------
# Pallas kernel: whole depth-0 generator forward for one batch TILE (TM rows).
# Activations live in a lane-dense (TM, L*C1) "time-flat" layout; all conv /
# norm-pooling work is plain MXU GEMMs, all element-wise math is f32.
#
# inputs (per grid step, all VMEM):
#   z_ref    : (TM, Z)     f32    latent rows
#   w1f_ref  : (Z, L*C1)   bf16   fused c1 weight  [z, t*C1+o] (pre-scaled)
#   w2_ref   : (L*C1, L*C1) bf16  banded c2 weight (Conv1d same-pad, pre-scaled)
#   wrgb_ref : (L*C1, 128) bf16   toRGB weight, columns c*L+t, zero-padded lanes
#   pool_ref : (L*C1, L*C1) bf16  kron(I_L, 1/C1) grouped-mean matrix
#   b1_ref   : (1, L*C1)   f32    c1 bias, tiled over time
#   b2_ref   : (1, L*C1)   f32    c2 bias, tiled over time
#   brgb_ref : (1, 128)    f32    toRGB bias (c*L+t order), zero-padded lanes
# output:
#   o_ref    : (TM, 128)   f32    lane-dense rgb rows (tanh-bounded)
# ----------------------------------------------------------------------------
def _gen_depth0_kernel(z_ref, w1f_ref, w2_ref, wrgb_ref, pool_ref,
                       b1_ref, b2_ref, brgb_ref, o_ref):
    eps = 1e-8
    slope = 0.2  # LeakyReLU negative slope

    def lrelu(x):
        return jnp.where(x >= 0, x, slope * x)

    def pixel_norm_grouped(x):
        # Per-(time-position) channel mean of x^2 via a grouped-average matmul:
        # stays lane-dense in the (TM, L*C1) layout.  pool_ref is read here (not
        # hoisted) so it is never live across the other matmuls.
        xx = (x * x).astype(jnp.bfloat16)
        mean_sq = jnp.dot(xx, pool_ref[...], preferred_element_type=jnp.float32)
        return x * jax.lax.rsqrt(mean_sq + eps)

    # ---- normalize_latents: pixel_norm on z (over all Z channels) ----------
    z = z_ref[...].astype(jnp.float32)                                # (TM, Z)
    z = z * jax.lax.rsqrt(jnp.mean(z * z, axis=-1, keepdims=True) + eps)

    # ---- c1: Conv1d(Z -> C1, kernel=L, pad=L-1) on length-1 input ----------
    # One fused MXU GEMM: (TM, Z) @ (Z, L*C1); equalized-LR scale folded in w.
    h = jnp.dot(z.astype(jnp.bfloat16), w1f_ref[...],
                preferred_element_type=jnp.float32) + b1_ref[...]     # (TM, L*C1)
    h = pixel_norm_grouped(lrelu(h))

    # ---- c2: Conv1d(C1 -> C1, kernel=KS, same pad) as one banded GEMM ------
    h = jnp.dot(h.astype(jnp.bfloat16), w2_ref[...],
                preferred_element_type=jnp.float32) + b2_ref[...]     # (TM, L*C1)
    h = pixel_norm_grouped(lrelu(h))

    # ---- toRGB: 1x1 equalized conv (block matmul, 128 lanes) + ScaledTanh --
    rgb = jnp.dot(h.astype(jnp.bfloat16), wrgb_ref[...],
                  preferred_element_type=jnp.float32) + brgb_ref[...]  # (TM, 128)
    o_ref[...] = jnp.tanh(rgb).astype(o_ref.dtype)


# ----------------------------------------------------------------------------
# One-time parameter preparation (hoisted out of the per-call path):
# transpose/flip, fold equalized-LR scales, build banded/block matrices,
# reorder + zero-pad toRGB to 128 lanes, cast MXU operands to bf16,
# tile biases over time.
# ----------------------------------------------------------------------------
def prepare_params(params, *, latent_size, initial_kernel_size, ksize, num_channels):
    Z, L, KS, Crgb = latent_size, initial_kernel_size, ksize, num_channels
    w1 = params["w1"]                      # (C1, Z, L)
    w2 = params["w2"]                      # (C1, C1, KS)
    wrgb = params["wrgb"][:, :, 0]         # (Crgb, C1)
    C1 = w1.shape[0]
    pad = (KS - 1) // 2

    scale1 = math.sqrt(2.0 / (Z * L))      # equalized-LR runtime scales
    scale2 = math.sqrt(2.0 / (C1 * KS))
    scale3 = math.sqrt(2.0 / C1)

    eyeL = jnp.eye(L, dtype=jnp.float32)

    # c1 fused weight: [z, t*C1 + o] = w1[o, z, L-1-t] * scale1
    w1f = jnp.transpose(jnp.flip(w1, axis=2), (1, 2, 0)).reshape(Z, L * C1) * scale1

    # c2 banded weight: [(t+s)*C1 + c, t*C1 + o] = w2[o, c, k] * scale2, s = k - pad
    w2big = jnp.zeros((L * C1, L * C1), jnp.float32)
    for k in range(KS):
        s = k - pad
        shift = jnp.eye(L, k=-s, dtype=jnp.float32)          # [t', t] = 1 iff t' = t+s
        w2big = w2big + jnp.kron(shift, jnp.transpose(w2[:, :, k]) * scale2)

    # toRGB weight with columns in "c*L + t" order (so the kernel output
    # reshapes straight to NCL with no transpose), zero-padded to >=128 lanes
    # so the kernel's output stores are full unmasked 128-lane vst.
    rgb_lanes = max(128, _round_up(L * Crgb, 128))
    wrgbbig = jnp.einsum('oc,tu->tocu', jnp.transpose(wrgb) * scale3, eyeL)
    wrgbbig = wrgbbig.reshape(L * C1, Crgb * L)
    wrgbbig = jnp.pad(wrgbbig, ((0, 0), (0, rgb_lanes - Crgb * L)))

    # toRGB bias in the same c*L+t order, zero-padded.
    brgb = jnp.pad(jnp.repeat(params["brgb"], L), (0, rgb_lanes - Crgb * L))

    # grouped-average matrix for pixel_norm in the time-flat layout.
    # Entries are 0 or 1/C1 -> exact in bf16.
    pool = jnp.kron(eyeL, jnp.full((C1, C1), 1.0 / C1, jnp.float32))

    return dict(
        w1f=w1f.astype(jnp.bfloat16),
        w2big=w2big.astype(jnp.bfloat16),
        wrgbbig=wrgbbig.astype(jnp.bfloat16),
        pool=pool.astype(jnp.bfloat16),
        b1=jnp.tile(params["b1"], L)[None, :].astype(jnp.float32),
        b2=jnp.tile(params["b2"], L)[None, :].astype(jnp.float32),
        brgb=brgb[None, :].astype(jnp.float32),
    )


# ----------------------------------------------------------------------------
# Wrapper: pallas_call with a ("parallel",) batch-TILE grid + NCL reshape.
# ----------------------------------------------------------------------------
def generator_forward(z, prep, *, initial_kernel_size, num_channels, tm=None):
    N, Z = z.shape
    L = initial_kernel_size
    Crgb = num_channels
    LCrgb = L * Crgb
    rgb_lanes = prep["wrgbbig"].shape[1]

    # Batch-tile size: 256 matches a single native 256x256 MXU pass on v6e/v7x
    # (2 passes on v5e's 128^2 MXU); for mid-size batches use >=2 tiles so both
    # v7x TensorCores get a full GEMM; tiny batches pad up to one sublane tile.
    if tm is None:
        if N >= 512:
            tm = 256
        elif N >= 16:
            tm = _round_up(_round_up(N, 2) // 2, 8)
        else:
            tm = _round_up(max(N, 1), 8)
    n_pad = _round_up(N, tm)
    z_p = z if n_pad == N else jnp.pad(z, ((0, n_pad - N), (0, 0)))

    out = pl.pallas_call(
        _gen_depth0_kernel,
        out_shape=jax.ShapeDtypeStruct((n_pad, rgb_lanes), jnp.float32),
        grid_spec=pltpu.PrefetchScalarGridSpec(
            num_scalar_prefetch=0,
            grid=(n_pad // tm,),
            in_specs=[
                pl.BlockSpec((tm, Z), lambda n: (n, 0)),
                pl.BlockSpec(prep["w1f"].shape, lambda n: (0, 0)),
                pl.BlockSpec(prep["w2big"].shape, lambda n: (0, 0)),
                pl.BlockSpec(prep["wrgbbig"].shape, lambda n: (0, 0)),
                pl.BlockSpec(prep["pool"].shape, lambda n: (0, 0)),
                pl.BlockSpec(prep["b1"].shape, lambda n: (0, 0)),
                pl.BlockSpec(prep["b2"].shape, lambda n: (0, 0)),
                pl.BlockSpec(prep["brgb"].shape, lambda n: (0, 0)),
            ],
            out_specs=pl.BlockSpec((tm, rgb_lanes), lambda n: (n, 0)),
        ),
        compiler_params=pltpu.CompilerParams(dimension_semantics=("parallel",)),
    )(z_p, prep["w1f"], prep["w2big"], prep["wrgbbig"], prep["pool"],
      prep["b1"], prep["b2"], prep["brgb"])

    # (n_pad, 128) lane-dense, columns in c*L+t order -> PyTorch NCL (N, Crgb, L)
    # via a pure slice + reshape (no transpose).
    return out[:N, :LCrgb].reshape(N, Crgb, L)


# ----------------------------------------------------------------------------
# Pure-JAX reference of the same assumed forward (for a correctness check).
# ----------------------------------------------------------------------------
def _reference_forward(z, params, *, initial_kernel_size, ksize, num_channels):
    eps, slope = 1e-8, 0.2
    N, Z = z.shape
    L, KS = initial_kernel_size, ksize
    pad = (KS - 1) // 2
    w1, b1 = params["w1"], params["b1"]
    w2, b2 = params["w2"], params["b2"]
    wrgb, brgb = params["wrgb"][:, :, 0], params["brgb"]
    C1 = w1.shape[0]
    s1 = math.sqrt(2.0 / (Z * L))
    s2 = math.sqrt(2.0 / (C1 * KS))
    s3 = math.sqrt(2.0 / C1)

    def pn(x):  # pixel_norm over channel axis of (N, C, T)
        return x * jax.lax.rsqrt(jnp.mean(x * x, axis=1, keepdims=True) + eps)

    def lrelu(x):
        return jnp.where(x >= 0, x, slope * x)

    zn = z * jax.lax.rsqrt(jnp.mean(z * z, axis=1, keepdims=True) + eps)
    h = jnp.einsum('nz,ozt->not', zn, jnp.flip(w1, axis=2)) * s1 + b1[None, :, None]
    h = pn(lrelu(h))
    hp = jnp.pad(h, ((0, 0), (0, 0), (pad, pad)))
    acc = jnp.zeros((N, C1, L), jnp.float32)
    for k in range(KS):
        acc = acc + jnp.einsum('nct,oc->not', hp[:, :, k:k + L], w2[:, :, k])
    h = pn(lrelu(acc * s2 + b2[None, :, None]))
    rgb = jnp.einsum('nct,oc->not', h, wrgb) * s3 + brgb[None, :, None]
    return jnp.tanh(rgb)


def init_params(key, latent_size, c1_out, num_channels, initial_kernel_size, ksize):
    """Deterministic synthetic parameters matching the module's layer shapes."""
    k1, k2, k3, k4, k5, k6 = jax.random.split(key, 6)
    return dict(
        w1=jax.random.normal(k1, (c1_out, latent_size, initial_kernel_size), jnp.float32),
        b1=0.1 * jax.random.normal(k2, (c1_out,), jnp.float32),
        w2=jax.random.normal(k3, (c1_out, c1_out, ksize), jnp.float32),
        b2=0.1 * jax.random.normal(k4, (c1_out,), jnp.float32),
        wrgb=jax.random.normal(k5, (num_channels, c1_out, 1), jnp.float32),
        brgb=0.1 * jax.random.normal(k6, (num_channels,), jnp.float32),
    )


if __name__ == "__main__":
    # Generator config (small, consistent with __init__):
    #   dataset_shape=(B, 4, 32), progression_scale=2, initial_size=3
    #     -> initial_kernel_size = 2**3 = 8
    #   fmap_base=64, fmap_max=32, fmap_min=8 -> nf(1) = 32
    #   latent_size=32, kernel_size=3, depth=0, alpha=1.0
    num_channels = 4
    latent_size = 32
    initial_kernel_size = 8
    ksize = 3
    nf1 = min(max(int(64 / 2.0 ** 1), 8), 32)  # = 32
    N = 2

    key = jax.random.PRNGKey(0)
    kz, kp = jax.random.split(key)
    z = jax.random.normal(kz, (N, latent_size), jnp.float32)
    raw = init_params(kp, latent_size, nf1, num_channels, initial_kernel_size, ksize)

    # One-time parameter prep (hoisted out of the per-call path).
    prep = prepare_params(raw, latent_size=latent_size,
                          initial_kernel_size=initial_kernel_size,
                          ksize=ksize, num_channels=num_channels)

    fwd = jax.jit(functools.partial(generator_forward,
                                    initial_kernel_size=initial_kernel_size,
                                    num_channels=num_channels))
    out = jax.block_until_ready(fwd(z, prep))

    assert out.shape == (N, num_channels, initial_kernel_size), out.shape
    assert bool(jnp.all(jnp.isfinite(out)))
    assert bool(jnp.all(jnp.abs(out) <= 1.0))  # tanh-bounded RGB output

    # Numerical check vs. pure-JAX f32 reference (bf16 MXU operands => loose tol).
    ref = _reference_forward(z, raw, initial_kernel_size=initial_kernel_size,
                             ksize=ksize, num_channels=num_channels)
    max_err = float(jnp.max(jnp.abs(out - ref)))
    assert max_err < 0.1, max_err

    print("KERNEL_OK")
</pallas_src>

<mosaic_0001>
module attributes {stable_mosaic.version = 11 : i64} {
  func.func @_gen_depth0_kernel(%arg0: i32, %arg1: memref<8x32xf32, #tpu.memory_space<vmem>>, %arg2: memref<32x256xbf16, #tpu.memory_space<vmem>>, %arg3: memref<256x256xbf16, #tpu.memory_space<vmem>>, %arg4: memref<256x128xbf16, #tpu.memory_space<vmem>>, %arg5: memref<256x256xbf16, #tpu.memory_space<vmem>>, %arg6: memref<1x256xf32, #tpu.memory_space<vmem>>, %arg7: memref<1x256xf32, #tpu.memory_space<vmem>>, %arg8: memref<1x128xf32, #tpu.memory_space<vmem>>, %arg9: memref<8x128xf32, #tpu.memory_space<vmem>>) attributes {dimension_semantics = [#tpu.dimension_semantics<parallel>], iteration_bounds = array<i64: 1>, scalar_prefetch = 0 : i64, scratch_operands = 0 : i64, tpu.core_type = #tpu.core_type<tc>, window_params = [{transform_indices = @transform_0, window_bounds = array<i64: 8, 32>}, {pipeline_mode = #tpu.pipeline_mode<synchronous>, transform_indices = @transform_1, window_bounds = array<i64: 32, 256>}, {pipeline_mode = #tpu.pipeline_mode<synchronous>, transform_indices = @transform_2, window_bounds = array<i64: 256, 256>}, {pipeline_mode = #tpu.pipeline_mode<synchronous>, transform_indices = @transform_3, window_bounds = array<i64: 256, 128>}, {pipeline_mode = #tpu.pipeline_mode<synchronous>, transform_indices = @transform_4, window_bounds = array<i64: 256, 256>}, {pipeline_mode = #tpu.pipeline_mode<synchronous>, transform_indices = @transform_5, window_bounds = array<i64: 1, 256>}, {pipeline_mode = #tpu.pipeline_mode<synchronous>, transform_indices = @transform_6, window_bounds = array<i64: 1, 256>}, {pipeline_mode = #tpu.pipeline_mode<synchronous>, transform_indices = @transform_7, window_bounds = array<i64: 1, 128>}, {transform_indices = @transform_8, window_bounds = array<i64: 8, 128>}]} {
    %c0 = arith.constant 0 : index
    %c0_0 = arith.constant 0 : index
    %0 = vector.load %arg1[%c0, %c0_0] : memref<8x32xf32, #tpu.memory_space<vmem>>, vector<8x32xf32>
    %1 = arith.mulf %0, %0 : vector<8x32xf32>
    %cst = arith.constant dense<0.000000e+00> : vector<8xf32>
    %2 = vector.multi_reduction <add>, %1, %cst [1] : vector<8x32xf32> to vector<8xf32>
    %3 = vector.shape_cast %2 : vector<8xf32> to vector<8x1xf32>
    %cst_1 = arith.constant 3.200000e+01 : f32
    %4 = vector.broadcast %cst_1 : f32 to vector<8x1xf32>
    %5 = arith.divf %3, %4 : vector<8x1xf32>
    %cst_2 = arith.constant 9.99999993E-9 : f32
    %6 = vector.broadcast %cst_2 : f32 to vector<8x1xf32>
    %7 = arith.addf %5, %6 : vector<8x1xf32>
    %8 = math.rsqrt %7 : vector<8x1xf32>
    %9 = vector.broadcast %8 : vector<8x1xf32> to vector<8x32xf32>
    %10 = arith.mulf %0, %9 : vector<8x32xf32>
    %11 = arith.truncf %10 : vector<8x32xf32> to vector<8x32xbf16>
    %c0_3 = arith.constant 0 : index
    %c0_4 = arith.constant 0 : index
    %12 = vector.load %arg2[%c0_3, %c0_4] : memref<32x256xbf16, #tpu.memory_space<vmem>>, vector<32x256xbf16>
    %cst_5 = arith.constant dense<0.000000e+00> : vector<8x256xf32>
    %13 = tpu.matmul %11, %12, %cst_5 {dimension_numbers = #tpu.dot_dimension_numbers<[1], [0], [0], [1], [0, 0, 1, 1], [], []>} : vector<8x32xbf16>, vector<32x256xbf16>, vector<8x256xf32> -> vector<8x256xf32>
    %c0_6 = arith.constant 0 : index
    %c0_7 = arith.constant 0 : index
    %14 = vector.load %arg6[%c0_6, %c0_7] : memref<1x256xf32, #tpu.memory_space<vmem>>, vector<1x256xf32>
    %15 = vector.broadcast %14 : vector<1x256xf32> to vector<8x256xf32>
    %16 = arith.addf %13, %15 : vector<8x256xf32>
    %cst_8 = arith.constant 0.000000e+00 : f32
    %17 = vector.broadcast %cst_8 : f32 to vector<8x256xf32>
    %18 = arith.cmpf oge, %16, %17 : vector<8x256xf32>
    %cst_9 = arith.constant 2.000000e-01 : f32
    %19 = vector.broadcast %cst_9 : f32 to vector<8x256xf32>
    %20 = arith.mulf %19, %16 : vector<8x256xf32>
    %21 = arith.select %18, %16, %20 : vector<8x256xi1>, vector<8x256xf32>
    %22 = arith.mulf %21, %21 : vector<8x256xf32>
    %23 = arith.truncf %22 : vector<8x256xf32> to vector<8x256xbf16>
    %c0_10 = arith.constant 0 : index
    %c0_11 = arith.constant 0 : index
    %24 = vector.load %arg5[%c0_10, %c0_11] : memref<256x256xbf16, #tpu.memory_space<vmem>>, vector<256x256xbf16>
    %cst_12 = arith.constant dense<0.000000e+00> : vector<8x256xf32>
    %25 = tpu.matmul %23, %24, %cst_12 {dimension_numbers = #tpu.dot_dimension_numbers<[1], [0], [0], [1], [0, 0, 1, 1], [], []>} : vector<8x256xbf16>, vector<256x256xbf16>, vector<8x256xf32> -> vector<8x256xf32>
    %cst_13 = arith.constant 9.99999993E-9 : f32
    %26 = vector.broadcast %cst_13 : f32 to vector<8x256xf32>
    %27 = arith.addf %25, %26 : vector<8x256xf32>
    %28 = math.rsqrt %27 : vector<8x256xf32>
    %29 = arith.mulf %21, %28 : vector<8x256xf32>
    %30 = arith.truncf %29 : vector<8x256xf32> to vector<8x256xbf16>
    %c0_14 = arith.constant 0 : index
    %c0_15 = arith.constant 0 : index
    %31 = vector.load %arg3[%c0_14, %c0_15] : memref<256x256xbf16, #tpu.memory_space<vmem>>, vector<256x256xbf16>
    %cst_16 = arith.constant dense<0.000000e+00> : vector<8x256xf32>
    %32 = tpu.matmul %30, %31, %cst_16 {dimension_numbers = #tpu.dot_dimension_numbers<[1], [0], [0], [1], [0, 0, 1, 1], [], []>} : vector<8x256xbf16>, vector<256x256xbf16>, vector<8x256xf32> -> vector<8x256xf32>
    %c0_17 = arith.constant 0 : index
    %c0_18 = arith.constant 0 : index
    %33 = vector.load %arg7[%c0_17, %c0_18] : memref<1x256xf32, #tpu.memory_space<vmem>>, vector<1x256xf32>
    %34 = vector.broadcast %33 : vector<1x256xf32> to vector<8x256xf32>
    %35 = arith.addf %32, %34 : vector<8x256xf32>
    %cst_19 = arith.constant 0.000000e+00 : f32
    %36 = vector.broadcast %cst_19 : f32 to vector<8x256xf32>
    %37 = arith.cmpf oge, %35, %36 : vector<8x256xf32>
    %cst_20 = arith.constant 2.000000e-01 : f32
    %38 = vector.broadcast %cst_20 : f32 to vector<8x256xf32>
    %39 = arith.mulf %38, %35 : vector<8x256xf32>
    %40 = arith.select %37, %35, %39 : vector<8x256xi1>, vector<8x256xf32>
    %41 = arith.mulf %40, %40 : vector<8x256xf32>
    %42 = arith.truncf %41 : vector<8x256xf32> to vector<8x256xbf16>
    %c0_21 = arith.constant 0 : index
    %c0_22 = arith.constant 0 : index
    %43 = vector.load %arg5[%c0_21, %c0_22] : memref<256x256xbf16, #tpu.memory_space<vmem>>, vector<256x256xbf16>
    %cst_23 = arith.constant dense<0.000000e+00> : vector<8x256xf32>
    %44 = tpu.matmul %42, %43, %cst_23 {dimension_numbers = #tpu.dot_dimension_numbers<[1], [0], [0], [1], [0, 0, 1, 1], [], []>} : vector<8x256xbf16>, vector<256x256xbf16>, vector<8x256xf32> -> vector<8x256xf32>
    %cst_24 = arith.constant 9.99999993E-9 : f32
    %45 = vector.broadcast %cst_24 : f32 to vector<8x256xf32>
    %46 = arith.addf %44, %45 : vector<8x256xf32>
    %47 = math.rsqrt %46 : vector<8x256xf32>
    %48 = arith.mulf %40, %47 : vector<8x256xf32>
    %49 = arith.truncf %48 : vector<8x256xf32> to vector<8x256xbf16>
    %c0_25 = arith.constant 0 : index
    %c0_26 = arith.constant 0 : index
    %50 = vector.load %arg4[%c0_25, %c0_26] : memref<256x128xbf16, #tpu.memory_space<vmem>>, vector<256x128xbf16>
    %cst_27 = arith.constant dense<0.000000e+00> : vector<8x128xf32>
    %51 = tpu.matmul %49, %50, %cst_27 {dimension_numbers = #tpu.dot_dimension_numbers<[1], [0], [0], [1], [0, 0, 1, 1], [], []>} : vector<8x256xbf16>, vector<256x128xbf16>, vector<8x128xf32> -> vector<8x128xf32>
    %c0_28 = arith.constant 0 : index
    %c0_29 = arith.constant 0 : index
    %52 = vector.load %arg8[%c0_28, %c0_29] : memref<1x128xf32, #tpu.memory_space<vmem>>, vector<1x128xf32>
    %53 = vector.broadcast %52 : vector<1x128xf32> to vector<8x128xf32>
    %54 = arith.addf %51, %53 : vector<8x128xf32>
    %55 = math.tanh %54 : vector<8x128xf32>
    %c0_30 = arith.constant 0 : index
    %c0_31 = arith.constant 0 : index
    %56 = vector.load %arg9[%c0_30, %c0_31] : memref<8x128xf32, #tpu.memory_space<vmem>>, vector<8x128xf32>
    tpu.vector_store %arg9[%c0_30, %c0_31], %55 {strides = array<i32>} : memref<8x128xf32, #tpu.memory_space<vmem>>, vector<8x128xf32>,
    return
  }
  func.func @transform_0(%arg0: i32) -> (i32, i32) {
    %c0_i32 = arith.constant 0 : i32
    %c0_i32_0 = arith.constant 0 : i32
    return %arg0, %c0_i32 : i32, i32
  }
  func.func @transform_1(%arg0: i32) -> (i32, i32) {
    %c0_i32 = arith.constant 0 : i32
    %c0_i32_0 = arith.constant 0 : i32
    %c0_i32_1 = arith.constant 0 : i32
    return %c0_i32, %c0_i32_0 : i32, i32
  }
  func.func @transform_2(%arg0: i32) -> (i32, i32) {
    %c0_i32 = arith.constant 0 : i32
    %c0_i32_0 = arith.constant 0 : i32
    %c0_i32_1 = arith.constant 0 : i32
    return %c0_i32, %c0_i32_0 : i32, i32
  }
  func.func @transform_3(%arg0: i32) -> (i32, i32) {
    %c0_i32 = arith.constant 0 : i32
    %c0_i32_0 = arith.constant 0 : i32
    %c0_i32_1 = arith.constant 0 : i32
    return %c0_i32, %c0_i32_0 : i32, i32
  }
  func.func @transform_4(%arg0: i32) -> (i32, i32) {
    %c0_i32 = arith.constant 0 : i32
    %c0_i32_0 = arith.constant 0 : i32
    %c0_i32_1 = arith.constant 0 : i32
    return %c0_i32, %c0_i32_0 : i32, i32
  }
  func.func @transform_5(%arg0: i32) -> (i32, i32) {
    %c0_i32 = arith.constant 0 : i32
    %c0_i32_0 = arith.constant 0 : i32
    %c0_i32_1 = arith.constant 0 : i32
    return %c0_i32, %c0_i32_0 : i32, i32
  }
  func.func @transform_6(%arg0: i32) -> (i32, i32) {
    %c0_i32 = arith.constant 0 : i32
    %c0_i32_0 = arith.constant 0 : i32
    %c0_i32_1 = arith.constant 0 : i32
    return %c0_i32, %c0_i32_0 : i32, i32
  }
  func.func @transform_7(%arg0: i32) -> (i32, i32) {
    %c0_i32 = arith.constant 0 : i32
    %c0_i32_0 = arith.constant 0 : i32
    %c0_i32_1 = arith.constant 0 : i32
    return %c0_i32, %c0_i32_0 : i32, i32
  }
  func.func @transform_8(%arg0: i32) -> (i32, i32) {
    %c0_i32 = arith.constant 0 : i32
    %c0_i32_0 = arith.constant 0 : i32
    return %arg0, %c0_i32 : i32, i32
  }
}

</mosaic_0001>

<bundles_post_ra>
// kernel: generator_forward.1
= control target key start
LH: loop header
LB: loop body
LE: loop exit
PB: predicated region body
PF: predicated region fallthrough
CT: control target
= control target key end

     0   :  { %13 = vsyncpa [#allocation3], 0  ;;  %s1492_s0 = inlined_call_operand.vmem [shape: f32[8,32], index: 0, kind: input, shape index: {}]   ;;  %s1493_s1 = inlined_call_operand.hbm [shape: bf16[32,256], index: 1, kind: input, shape index: {}]   ;;  %s1494_s2 = inlined_call_operand.hbm [shape: bf16[256,256], index: 2, kind: input, shape index: {}]   ;;  %s1495_s3 = inlined_call_operand.hbm [shape: bf16[256,128], index: 3, kind: input, shape index: {}]   ;;  %s1496_s4 = inlined_call_operand.hbm [shape: bf16[256,256], index: 4, kind: input, shape index: {}]   ;;  %s1497_s5 = inlined_call_operand.vmem [shape: f32[1,256], index: 5, kind: input, shape index: {}]   ;;  %s1498_s6 = inlined_call_operand.vmem [shape: f32[1,256], index: 6, kind: input, shape index: {}]   ;;  %s1499_s7 = inlined_call_operand.vmem [shape: f32[1,128], index: 7, kind: input, shape index: {}]   ;;  %s1500_s8 = inlined_call_operand.vmem [shape: f32[8,128], index: 8, kind: output, shape index: {}]  }
   0x1   :  { %14 = vsyncpa [#allocation5], 0 }
   0x2   :  { %15 = vsyncpa [#allocation8], 0  ;;  %s1245_s27 = smov [#allocation4]   ;;  %s1246_s29 = smov [#allocation2]  }
   0x3   :  { %s35_s28 = sshll.u32 %s1245_s27, 4  ;;  %s23_s30 = sshll.u32 %s1246_s29, 4  ;;  %s36_s28 = int_to_ptr.vmem [resolvable:$true] %s35_s28  ;;  %s24_s30 = int_to_ptr.vmem [resolvable:$true] %s23_s30 }
   0x4   :  { %s1167_s9 = scalar_lea.vmem %s36_s28, 4096  ;;  %p1172_p1 = scmp.lt.s32.totalorder %s36_s28, %s36_s28 }
   0x5   :  { %p1168_p0 = scmp.ne.s32.totalorder %s36_s28, %s1167_s9  ;;  %p1173_p2 = scmp.lt.s32.totalorder %s1167_s9, %s1167_s9 }
   0x7   :  { %p1174_p3 = por %p1173_p2, %p1172_p1 }
   0x9   :  { %p1175_p4 = pnand %p1174_p3, %p1168_p0 }
   0xb   :  { %1178 = shalt.err (!%p1175_p4)
}
   0xc   :  { %s1247_s10 = smov 128   ;;  %s1248_s11 = smov 8  }
   0xd   :  { %41 = dma.hbm_to_vmem [thread:$0]  %s1494_s2, 4096, %s36_s28, [#allocation5], %s1247_s10, %s1247_s10, %s1248_s11  }
   0xe   :  { %s1187_s14 = scalar_lea.vmem %s24_s30, 512  ;;  %p1192_p6 = scmp.lt.s32.totalorder %s24_s30, %s24_s30 }
   0xf   :  { %p1188_p5 = scmp.ne.s32.totalorder %s24_s30, %s1187_s14  ;;  %p1193_p7 = scmp.lt.s32.totalorder %s1187_s14, %s1187_s14 }
  0x11   :  { %p1194_p8 = por %p1193_p7, %p1192_p6 }
  0x13   :  { %p1195_p9 = pnand %p1194_p8, %p1188_p5 }
  0x15   :  { %1198 = shalt.err (!%p1195_p9)
}
  0x16   :  { %29 = dma.hbm_to_vmem [thread:$0]  %s1493_s1, 512, %s24_s30, [#allocation3], %s1247_s10, %s1247_s10, %s1248_s11  }
  0x17   :  { %s1249_s17 = smov [#allocation6]  }
  0x18   :  { %s47_s18 = sshll.u32 %s1249_s17, 4  ;;  %s48_s18 = int_to_ptr.vmem [resolvable:$true] %s47_s18 }
  0x19   :  { %s1207_s19 = scalar_lea.vmem %s48_s18, 2048  ;;  %p1212_p11 = scmp.lt.s32.totalorder %s48_s18, %s48_s18 }
  0x1a   :  { %p1208_p10 = scmp.ne.s32.totalorder %s48_s18, %s1207_s19  ;;  %p1213_p12 = scmp.lt.s32.totalorder %s1207_s19, %s1207_s19 }
  0x1c   :  { %p1214_p13 = por %p1213_p12, %p1212_p11 }
  0x1e   :  { %p1215_p0 = pnand %p1214_p13, %p1208_p10 }
  0x20   :  { %1218 = shalt.err (!%p1215_p0)
}
  0x21   :  { %s1250_s2 = smov 64   ;;  %s1251_s20 = smov 4  }
  0x22   :  { %53 = dma.hbm_to_vmem [thread:$0]  %s1495_s3, 2048, %s48_s18, [#allocation5], %s1250_s2, %s1250_s2, %s1251_s20  }
  0x23   :  { %s1252_s23 = smov [#allocation7]  }
  0x24   :  { %s59_s24 = sshll.u32 %s1252_s23, 4  ;;  %s60_s24 = int_to_ptr.vmem [resolvable:$true] %s59_s24 }
  0x25   :  { %s1227_s1 = scalar_lea.vmem %s60_s24, 4096  ;;  %p1232_p2 = scmp.lt.s32.totalorder %s60_s24, %s60_s24 }
  0x26   :  { %p1228_p1 = scmp.ne.s32.totalorder %s60_s24, %s1227_s1  ;;  %p1233_p3 = scmp.lt.s32.totalorder %s1227_s1, %s1227_s1 }
  0x28   :  { %p1234_p4 = por %p1233_p3, %p1232_p2 }
  0x2a   :  { %p1235_p5 = pnand %p1234_p4, %p1228_p1 }
  0x2c   :  { %1238 = shalt.err (!%p1235_p5)
}
  0x2d   :  { %65 = dma.hbm_to_vmem [thread:$0]  %s1496_s4, 4096, %s60_s24, [#allocation8], %s1247_s10, %s1247_s10, %s1248_s11  }
  0x2e   :  { %1239 = dma.done.wait [#allocation3], 512  }
  0x2f   :  { %1240 = vsyncadd [#allocation3], 4294966784 }
  0x30   :  { %1241 = dma.done.wait [#allocation5], 6144  }
  0x31   :  { %1242 = vsyncadd [#allocation5], 4294961152 }
  0x32   :  { %1243 = dma.done.wait [#allocation8], 4096  }
  0x33   :  { %1244 = vsyncadd [#allocation8], 4294963200  ;;  %v1323_v0 = vld [vmem:[%s1492_s0] sm:$0xff]  ;;  %vm87_vm0 = vcmask 261120   ;;  %v1029_v3 = vld [vmem:[#allocation2 + $0x14] ss:$8 sps:$4 sm:$0xff]  }
  0x34   :  { %v86_v1 = vmul.f32 %v1323_v0, %v1323_v0  ;;  %v1031_v4 = vld [vmem:[#allocation2 + $0x10] ss:$8 sps:$4 sm:$0xff]   ;;  %v1032_v5 = vld [vmem:[#allocation2 + $0x4] ss:$8 sps:$4 sm:$0xff]   ;;  %v1034_v6 = vld [vmem:[#allocation2] ss:$8 sps:$4 sm:$0xff]   ;;  %148 = vmatprep.subr.bf16.mxu0 %v1029_v3 }
  0x35   :  { %v1253_v7 = vmov 0   ;;  %149 = vmatpush1.bf16.msra.mxu0 %v1031_v4  ;;  %v1328_v8 = vld [vmem:[#allocation7 + $0x74] ss:$8 sps:$4 sm:$0xff]   ;;  %v1330_v9 = vld [vmem:[#allocation7 + $0x70] ss:$8 sps:$4 sm:$0xff]  }
  0x36   :  { %v88_v2 = vsel %vm87_vm0, %v86_v1, 0.0  ;;  %168 = vmatprep.mubr.bf16.mxu0 %v1253_v7  ;;  %150 = vmatprep.subr.bf16.mxu0 %v1032_v5  ;;  %v1332_v10 = vld [vmem:[#allocation7 + $0x64] ss:$8 sps:$4 sm:$0xff]   ;;  %v1336_v11 = vld [vmem:[#allocation7 + $0x60] ss:$8 sps:$4 sm:$0xff]  }
  0x37   :  { %89 = vadd.xlane.f32.xlu0 %v88_v2  ;;  %379 = vmatprep.subr.bf16.mxu1 %v1328_v8  ;;  %v1339_v12 = vld [vmem:[#allocation7 + $0x54] ss:$8 sps:$4 sm:$0xff]   ;;  %v1342_v13 = vld [vmem:[#allocation7 + $0x50] ss:$8 sps:$4 sm:$0xff]   ;;  %v1345_v14 = vld [vmem:[#allocation7 + $0x44] ss:$8 sps:$4 sm:$0xff]   ;;  %v103_v2 = vlaneseq }
  0x38   :  { %380 = vmatpush1.bf16.msra.mxu1 %v1330_v9  ;;  %v1348_v15 = vld [vmem:[#allocation7 + $0x40] ss:$8 sps:$4 sm:$0xff]   ;;  %v1351_v16 = vld [vmem:[#allocation7 + $0x34] ss:$8 sps:$4 sm:$0xff]   ;;  %v1354_v17 = vld [vmem:[#allocation7 + $0x30] ss:$8 sps:$4 sm:$0xff]  }
  0x39   :  { %151 = vmatpush1.bf16.msra.mxu0 %v1034_v6  ;;  %381 = vmatprep.subr.bf16.mxu1 %v1332_v10  ;;  %v1357_v18 = vld [vmem:[#allocation7 + $0x24] ss:$8 sps:$4 sm:$0xff]   ;;  %v1360_v19 = vld [vmem:[#allocation7 + $0x20] ss:$8 sps:$4 sm:$0xff]   ;;  %v1363_v20 = vld [vmem:[#allocation7 + $0x14] ss:$8 sps:$4 sm:$0xff]  }
  0x3a   :  { %v1366_v21 = vld [vmem:[#allocation7 + $0x10] ss:$8 sps:$4 sm:$0xff]   ;;  %v1369_v22 = vld [vmem:[#allocation7 + $0x4] ss:$8 sps:$4 sm:$0xff]   ;;  %v1372_v23 = vld [vmem:[#allocation7] ss:$8 sps:$4 sm:$0xff]  }
  0x3b   :  { %v1375_v24 = vld [vmem:[#allocation7 + $0xf4] ss:$8 sps:$4 sm:$0xff]   ;;  %v1378_v25 = vld [vmem:[#allocation7 + $0xf0] ss:$8 sps:$4 sm:$0xff]   ;;  %v1381_v26 = vld [vmem:[#allocation7 + $0xe4] ss:$8 sps:$4 sm:$0xff]  }
  0x3c   :  { %382 = vmatpush1.bf16.msra.mxu1 %v1336_v11  ;;  %v1384_v27 = vld [vmem:[#allocation7 + $0xe0] ss:$8 sps:$4 sm:$0xff]   ;;  %v1387_v28 = vld [vmem:[#allocation7 + $0xd4] ss:$8 sps:$4 sm:$0xff]   ;;  %v1390_v29 = vld [vmem:[#allocation7 + $0xd0] ss:$8 sps:$4 sm:$0xff]  }
  0x3d   :  { %383 = vmatprep.subr.bf16.mxu1 %v1339_v12  ;;  %v1393_v30 = vld [vmem:[#allocation7 + $0xc4] ss:$8 sps:$4 sm:$0xff]   ;;  %v1396_v31 = vld [vmem:[#allocation7 + $0xc0] ss:$8 sps:$4 sm:$0xff]   ;;  %v1399_v32 = vld [vmem:[#allocation7 + $0xb4] ss:$8 sps:$4 sm:$0xff]  }
  0x3e   :  { %v1402_v33 = vld [vmem:[#allocation7 + $0xb0] ss:$8 sps:$4 sm:$0xff]   ;;  %v1408_v40 = vld [vmem:[#allocation7 + $0xa4] ss:$8 sps:$4 sm:$0xff]   ;;  %v1410_v41 = vld [vmem:[#allocation7 + $0xa0] ss:$8 sps:$4 sm:$0xff]  }
  0x3f   :  { %v1414_v42 = vld [vmem:[#allocation7 + $0x94] ss:$8 sps:$4 sm:$0xff]   ;;  %v1416_v43 = vld [vmem:[#allocation7 + $0x90] ss:$8 sps:$4 sm:$0xff]   ;;  %v1420_v44 = vld [vmem:[#allocation7 + $0x84] ss:$8 sps:$4 sm:$0xff]  }
  0x40   :  { %384 = vmatpush1.bf16.msra.mxu1 %v1342_v13  ;;  %v1422_v45 = vld [vmem:[#allocation7 + $0x80] ss:$8 sps:$4 sm:$0xff]   ;;  %v1083_v46 = vld [vmem:[#allocation4 + $0x70] ss:$8 sps:$4 sm:$0xff]   ;;  %v1085_v47 = vld [vmem:[#allocation4 + $0x74] ss:$8 sps:$4 sm:$0xff]  }
  0x41   :  { %385 = vmatprep.subr.bf16.mxu1 %v1345_v14  ;;  %v1088_v48 = vld [vmem:[#allocation4 + $0x64] ss:$8 sps:$4 sm:$0xff]   ;;  %630 = vmatprep.subr.bf16.mxu0 %v1085_v47  ;;  %v1086_v49 = vld [vmem:[#allocation4 + $0x60] ss:$8 sps:$4 sm:$0xff]   ;;  %v1091_v50 = vld [vmem:[#allocation4 + $0x54] ss:$8 sps:$4 sm:$0xff]  }
  0x42   :  { %v1089_v51 = vld [vmem:[#allocation4 + $0x50] ss:$8 sps:$4 sm:$0xff]   ;;  %v1094_v52 = vld [vmem:[#allocation4 + $0x44] ss:$8 sps:$4 sm:$0xff]   ;;  %v1092_v53 = vld [vmem:[#allocation4 + $0x40] ss:$8 sps:$4 sm:$0xff]  }
  0x43   :  { %v1097_v54 = vld [vmem:[#allocation4 + $0x34] ss:$8 sps:$4 sm:$0xff]   ;;  %v1095_v55 = vld [vmem:[#allocation4 + $0x30] ss:$8 sps:$4 sm:$0xff]   ;;  %v1100_v56 = vld [vmem:[#allocation4 + $0x24] ss:$8 sps:$4 sm:$0xff]  }
  0x44   :  { %386 = vmatpush1.bf16.msra.mxu1 %v1348_v15  ;;  %v1098_v57 = vld [vmem:[#allocation4 + $0x20] ss:$8 sps:$4 sm:$0xff]   ;;  %v1103_v58 = vld [vmem:[#allocation4 + $0x14] ss:$8 sps:$4 sm:$0xff]   ;;  %v1101_v59 = vld [vmem:[#allocation4 + $0x10] ss:$8 sps:$4 sm:$0xff]  }
  0x45   :  { %387 = vmatprep.subr.bf16.mxu1 %v1351_v16  ;;  %v1106_v60 = vld [vmem:[#allocation4 + $0x4] ss:$8 sps:$4 sm:$0xff]   ;;  %v1104_v61 = vld [vmem:[#allocation4] ss:$8 sps:$4 sm:$0xff]   ;;  %v1109_v62 = vld [vmem:[#allocation4 + $0xf4] ss:$8 sps:$4 sm:$0xff]  }
  0x46   :  { %v1107_v63 = vld [vmem:[#allocation4 + $0xf0] ss:$8 sps:$4 sm:$0xff]   ;;  %v1110_v1 = vld [vmem:[#allocation4 + $0xe0] ss:$8 sps:$4 sm:$0xff]   ;;  %v1427_v3 = vshrl.u32 %v103_v2, 7 }
  0x47   :  { %v101_v5 = vld [vmem:[%s1497_s5] sm:$0x3] }
  0x48   :  { %388 = vmatpush1.bf16.msra.mxu1 %v1354_v17  ;;  %v105_v4 = vsub.s32 0, %v1427_v3  ;;  %v109_v6 = vsub.s32 1, %v1427_v3  ;;  %v1135_v3 = vld [vmem:[#allocation6 + $0x68] sm:$0xff]  }
  0x49   :  { %389 = vmatprep.subr.bf16.mxu1 %v1357_v18 }
  0x4a   :  { %v106_v7 = vrot.slane %v101_v5, %v105_v4 }
  0x4c   :  { %390 = vmatpush1.bf16.msra.mxu1 %v1360_v19 }
  0x4d   :  { %391 = vmatprep.subr.bf16.mxu1 %v1363_v20 }
  0x50   :  { %392 = vmatpush1.bf16.msra.mxu1 %v1366_v21 }
  0x51   :  { %393 = vmatprep.subr.bf16.mxu1 %v1369_v22 }
  0x54   :  { %394 = vmatpush1.bf16.msra.mxu1 %v1372_v23 }
  0x55   :  { %395 = vmatprep.subr.bf16.mxu1 %v1375_v24 }
  0x58   :  { %396 = vmatpush2.bf16.msra.mxu1 %v1378_v25 }
  0x59   :  { %397 = vmatprep.subr.bf16.mxu1 %v1381_v26 }
  0x5c   :  { %398 = vmatpush2.bf16.msra.mxu1 %v1384_v27 }
  0x5d   :  { %399 = vmatprep.subr.bf16.mxu1 %v1387_v28 }
  0x60   :  { %400 = vmatpush2.bf16.msra.mxu1 %v1390_v29 }
  0x61   :  { %401 = vmatprep.subr.bf16.mxu1 %v1393_v30 }
  0x64   :  { %402 = vmatpush2.bf16.msra.mxu1 %v1396_v31 }
  0x65   :  { %403 = vmatprep.subr.bf16.mxu1 %v1399_v32 }
  0x68   :  { %404 = vmatpush2.bf16.msra.mxu1 %v1402_v33 }
  0x69   :  { %405 = vmatprep.subr.bf16.mxu1 %v1408_v40 }
  0x6c   :  { %406 = vmatpush2.bf16.msra.mxu1 %v1410_v41 }
  0x6d   :  { %407 = vmatprep.subr.bf16.mxu1 %v1414_v42 }
  0x70   :  { %408 = vmatpush2.bf16.msra.mxu1 %v1416_v43 }
  0x71   :  { %409 = vmatprep.subr.bf16.mxu1 %v1420_v44 }
  0x74   :  { %410 = vmatpush2.bf16.msra.mxu1 %v1422_v45 }
  0x75   :  { %681 = vmatprep.subr.bf16.mxu1 %v1328_v8  ;;  %v110_v8 = vrot.slane %v101_v5, %v109_v6 }
  0xc0   :  { %v90_v34 = vpop.xlane.xlu0 %89 }
  0xc1   :  { %v92_v35 = vmul.f32 0.03125, %v90_v34 }
  0xc3   :  { %v93_v36 = vadd.f32 1e-08, %v92_v35 }
  0xc5   :  { %1147 = vrsqrt.f32 %v93_v36 }
  0xd2   :  { %v1148_v37 = vpop.eup %1147 }
  0xd3   :  { %v95_v38 = vmul.f32 %v1148_v37, %v1323_v0  ;;  %v1112_v0 = vld [vmem:[#allocation4 + $0xe4] ss:$8 sps:$4 sm:$0xff]  }
  0xd5   :  { %v96_v39 = vpack.c.bf16 %v95_v38, %v95_v38 }
  0xd7   :  { %916 = vmatmul.mubr.msk.bf16.vlgmr.msra.gmra.mxu0 %vm87_vm0, %v96_v39 }
  0xd8   :  { %631 = vmatpush1.bf16.msra.mxu0 %v1083_v46 }
  0xd9   :  { %632 = vmatprep.subr.bf16.mxu0 %v1088_v48 }
  0xdc   :  { %633 = vmatpush1.bf16.msra.mxu0 %v1086_v49 }
  0xdd   :  { %634 = vmatprep.subr.bf16.mxu0 %v1091_v50 }
  0xe0   :  { %635 = vmatpush1.bf16.msra.mxu0 %v1089_v51 }
  0xe1   :  { %636 = vmatprep.subr.bf16.mxu0 %v1094_v52 }
  0xe4   :  { %637 = vmatpush1.bf16.msra.mxu0 %v1092_v53 }
  0xe5   :  { %638 = vmatprep.subr.bf16.mxu0 %v1097_v54 }
  0xe8   :  { %639 = vmatpush1.bf16.msra.mxu0 %v1095_v55 }
  0xe9   :  { %640 = vmatprep.subr.bf16.mxu0 %v1100_v56 }
  0xec   :  { %641 = vmatpush1.bf16.msra.mxu0 %v1098_v57 }
  0xed   :  { %642 = vmatprep.subr.bf16.mxu0 %v1103_v58 }
  0xf0   :  { %643 = vmatpush1.bf16.msra.mxu0 %v1101_v59 }
  0xf1   :  { %644 = vmatprep.subr.bf16.mxu0 %v1106_v60 }
  0xf4   :  { %645 = vmatpush1.bf16.msra.mxu0 %v1104_v61 }
  0xf5   :  { %646 = vmatprep.subr.bf16.mxu0 %v1109_v62 }
  0xf8   :  { %647 = vmatpush2.bf16.msra.mxu0 %v1107_v63 }
  0xf9   :  { %648 = vmatprep.subr.bf16.mxu0 %v1112_v0 }
  0xfc   :  { %649 = vmatpush2.bf16.msra.mxu0 %v1110_v1 }
 0x197   :  { %v170_v34 = vpop.f32.mrf.mxu0 }
 0x198   :  { %v171_v35 = vadd.f32 %v170_v34, %v106_v7  ;;  %v1138_v7 = vld [vmem:[#allocation6 + $0x20] sm:$0xff]   ;;  %v1140_v34 = vld [vmem:[#allocation6 + $0x18] sm:$0xff]  }
 0x199   :  { %v172_v36 = vpop.f32.mrf.mxu0 }
 0x19a   :  { %vm177_vm1 = vcmp.ge.f32.partialorder %v171_v35, 0.0  ;;  %v179_v37 = vmul.f32 0.2, %v171_v35  ;;  %v173_v38 = vadd.f32 %v172_v36, %v110_v8  ;;  %v1139_v8 = vld [vmem:[#allocation6 + $0x58] sm:$0xff]   ;;  %v1142_v36 = vld [vmem:[#allocation6 + $0x10] sm:$0xff]  }
 0x19b   :  { %v174_v39 = vpop.f32.mrf.mxu0 }
 0x19c   :  { %v1438_v46 = vsel %vm177_vm1, %v171_v35, %v179_v37  ;;  %v180_v47 = vmul.f32 0.2, %v173_v38  ;;  %vm178_vm2 = vcmp.ge.f32.partialorder %v173_v38, 0.0  ;;  %v1141_v35 = vld [vmem:[#allocation6 + $0x50] sm:$0xff]   ;;  %v1143_v37 = vld [vmem:[#allocation6 + $0x48] sm:$0xff]   ;;  %v1145_v39 = vld [vmem:[#allocation6 + $0x40] sm:$0xff]  }
 0x19d   :  { %v175_v48 = vpop.f32.mrf.mxu0  ;;  %v183_v50 = vmul.f32 %v1438_v46, %v1438_v46 }
 0x19e   :  { %v1440_v49 = vsel %vm178_vm2, %v173_v38, %v180_v47  ;;  %v1144_v38 = vld [vmem:[#allocation6 + $0x8] sm:$0xff]  }
 0x19f   :  { %v184_v51 = vmul.f32 %v1440_v49, %v1440_v49  ;;  %v185_v53 = vpack.c.bf16 %v183_v50, %v183_v50 }
 0x1a1   :  { %v186_v52 = vpack.c.bf16 %v184_v51, %v184_v51 }
 0x1a3   :  { %411 = vmatprep.mubr.bf16.mxu1 %v186_v52 }
 0x1a4   :  { %412 = vmatmul.mubr.bf16.vlgmr.msra.gmra.mxu1 %v185_v53 }
 0x1a5   :  { %682 = vmatpush1.bf16.msra.mxu1 %v1330_v9  ;;  %v1115_v9 = vld [vmem:[#allocation4 + $0xd4] ss:$8 sps:$4 sm:$0xff]  }
 0x1a6   :  { %683 = vmatprep.subr.bf16.mxu1 %v1332_v10  ;;  %v1113_v10 = vld [vmem:[#allocation4 + $0xd0] ss:$8 sps:$4 sm:$0xff]   ;;  %650 = vmatprep.subr.bf16.mxu0 %v1115_v9 }
 0x1a7   :  { %651 = vmatpush2.bf16.msra.mxu0 %v1113_v10 }
 0x1a9   :  { %684 = vmatpush1.bf16.msra.mxu1 %v1336_v11  ;;  %v1118_v11 = vld [vmem:[#allocation4 + $0xc4] ss:$8 sps:$4 sm:$0xff]  }
 0x1aa   :  { %685 = vmatprep.subr.bf16.mxu1 %v1339_v12  ;;  %v1116_v12 = vld [vmem:[#allocation4 + $0xc0] ss:$8 sps:$4 sm:$0xff]   ;;  %652 = vmatprep.subr.bf16.mxu0 %v1118_v11 }
 0x1ab   :  { %653 = vmatpush2.bf16.msra.mxu0 %v1116_v12 }
 0x1ad   :  { %686 = vmatpush1.bf16.msra.mxu1 %v1342_v13  ;;  %v1119_v13 = vld [vmem:[#allocation4 + $0xb0] ss:$8 sps:$4 sm:$0xff]  }
 0x1ae   :  { %687 = vmatprep.subr.bf16.mxu1 %v1345_v14  ;;  %v1121_v14 = vld [vmem:[#allocation4 + $0xb4] ss:$8 sps:$4 sm:$0xff]  }
 0x1af   :  { %654 = vmatprep.subr.bf16.mxu0 %v1121_v14 }
 0x1b0   :  { %655 = vmatpush2.bf16.msra.mxu0 %v1119_v13 }
 0x1b1   :  { %688 = vmatpush1.bf16.msra.mxu1 %v1348_v15  ;;  %v1124_v15 = vld [vmem:[#allocation4 + $0xa4] ss:$8 sps:$4 sm:$0xff]  }
 0x1b2   :  { %689 = vmatprep.subr.bf16.mxu1 %v1351_v16  ;;  %v1122_v16 = vld [vmem:[#allocation4 + $0xa0] ss:$8 sps:$4 sm:$0xff]   ;;  %656 = vmatprep.subr.bf16.mxu0 %v1124_v15 }
 0x1b3   :  { %v981_v15 = vld [vmem:[%s1499_s7] ss:$0 sm:$0xff] }
 0x1b4   :  { %657 = vmatpush2.bf16.msra.mxu0 %v1122_v16 }
 0x1b5   :  { %690 = vmatpush1.bf16.msra.mxu1 %v1354_v17  ;;  %v1127_v17 = vld [vmem:[#allocation4 + $0x94] ss:$8 sps:$4 sm:$0xff]  }
 0x1b6   :  { %691 = vmatprep.subr.bf16.mxu1 %v1357_v18  ;;  %v1125_v18 = vld [vmem:[#allocation4 + $0x90] ss:$8 sps:$4 sm:$0xff]   ;;  %658 = vmatprep.subr.bf16.mxu0 %v1127_v17 }
 0x1b8   :  { %659 = vmatpush2.bf16.msra.mxu0 %v1125_v18 }
 0x1b9   :  { %692 = vmatpush1.bf16.msra.mxu1 %v1360_v19  ;;  %v1130_v19 = vld [vmem:[#allocation4 + $0x84] ss:$8 sps:$4 sm:$0xff]  }
 0x1ba   :  { %693 = vmatprep.subr.bf16.mxu1 %v1363_v20  ;;  %v1128_v20 = vld [vmem:[#allocation4 + $0x80] ss:$8 sps:$4 sm:$0xff]   ;;  %660 = vmatprep.subr.bf16.mxu0 %v1130_v19 }
 0x1bc   :  { %661 = vmatpush2.bf16.msra.mxu0 %v1128_v20 }
 0x1bd   :  { %694 = vmatpush1.bf16.msra.mxu1 %v1366_v21 }
 0x1be   :  { %695 = vmatprep.subr.bf16.mxu1 %v1369_v22 }
 0x1c1   :  { %696 = vmatpush1.bf16.msra.mxu1 %v1372_v23 }
 0x1c2   :  { %697 = vmatprep.subr.bf16.mxu1 %v1375_v24 }
 0x1c5   :  { %698 = vmatpush2.bf16.msra.mxu1 %v1378_v25 }
 0x1c6   :  { %699 = vmatprep.subr.bf16.mxu1 %v1381_v26 }
 0x1c9   :  { %700 = vmatpush2.bf16.msra.mxu1 %v1384_v27 }
 0x1ca   :  { %701 = vmatprep.subr.bf16.mxu1 %v1387_v28 }
 0x1cd   :  { %702 = vmatpush2.bf16.msra.mxu1 %v1390_v29 }
 0x1ce   :  { %703 = vmatprep.subr.bf16.mxu1 %v1393_v30 }
 0x1d1   :  { %704 = vmatpush2.bf16.msra.mxu1 %v1396_v31 }
 0x1d2   :  { %705 = vmatprep.subr.bf16.mxu1 %v1399_v32 }
 0x1d5   :  { %706 = vmatpush2.bf16.msra.mxu1 %v1402_v33  ;;  %v1131_v33 = vld [vmem:[#allocation6 + $0x78] sm:$0xff]  }
 0x1d6   :  { %707 = vmatprep.subr.bf16.mxu1 %v1408_v40  ;;  %v1132_v40 = vld [vmem:[#allocation6 + $0x38] sm:$0xff]   ;;  %998 = vmatprep.subr.bf16.mxu0 %v1131_v33 }
 0x1d9   :  { %708 = vmatpush2.bf16.msra.mxu1 %v1410_v41  ;;  %v1133_v41 = vld [vmem:[#allocation6 + $0x70] sm:$0xff]  }
 0x1da   :  { %709 = vmatprep.subr.bf16.mxu1 %v1414_v42  ;;  %v1134_v42 = vld [vmem:[#allocation6 + $0x30] sm:$0xff]  }
 0x1dd   :  { %710 = vmatpush2.bf16.msra.mxu1 %v1416_v43  ;;  %v458_v43 = vld [vmem:[%s1498_s6] sm:$0x3] }
 0x1de   :  { %711 = vmatprep.subr.bf16.mxu1 %v1420_v44  ;;  %v463_v44 = vrot.slane %v458_v43, %v105_v4  ;;  %v1136_v4 = vld [vmem:[#allocation6 + $0x28] sm:$0xff]  }
 0x1e1   :  { %712 = vmatpush2.bf16.msra.mxu1 %v1422_v45  ;;  %v467_v45 = vrot.slane %v458_v43, %v109_v6  ;;  %v1137_v6 = vld [vmem:[#allocation6 + $0x60] sm:$0xff]  }
 0x264   :  { %v413_v21 = vpop.f32.mrf.mxu1 }
 0x265   :  { %v414_v22 = vadd.f32 1e-08, %v413_v21 }
 0x266   :  { %v415_v23 = vpop.f32.mrf.mxu1 }
 0x267   :  { %1149 = vrsqrt.f32 %v414_v22  ;;  %v416_v24 = vadd.f32 1e-08, %v415_v23 }
 0x268   :  { %v417_v25 = vpop.f32.mrf.mxu1 }
 0x269   :  { %1151 = vrsqrt.f32 %v416_v24 }
 0x26a   :  { %v418_v26 = vpop.f32.mrf.mxu1 }
 0x274   :  { %v1150_v27 = vpop.eup %1149 }
 0x275   :  { %v422_v29 = vmul.f32 %v1150_v27, %v1438_v46  ;;  %v1146_v46 = vld [vmem:[#allocation6] sm:$0xff]  }
 0x276   :  { %v1152_v28 = vpop.eup %1151 }
 0x277   :  { %v423_v30 = vmul.f32 %v1152_v28, %v1440_v49  ;;  %v424_v32 = vpack.c.bf16 %v422_v29, %v422_v29 }
 0x279   :  { %v425_v31 = vpack.c.bf16 %v423_v30, %v423_v30 }
 0x27b   :  { %662 = vmatprep.mubr.bf16.mxu0 %v425_v31 }
 0x27c   :  { %663 = vmatmul.mubr.bf16.vlgmr.msra.gmra.mxu0 %v424_v32 }
 0x27d   :  { %999 = vmatpush3.bf16.msra.mxu0 %v1132_v40 }
 0x27e   :  { %1000 = vmatprep.subr.bf16.mxu0 %v1133_v41 }
 0x281   :  { %1001 = vmatpush3.bf16.msra.mxu0 %v1134_v42 }
 0x282   :  { %1002 = vmatprep.subr.bf16.mxu0 %v1135_v3 }
 0x285   :  { %1003 = vmatpush3.bf16.msra.mxu0 %v1136_v4 }
 0x286   :  { %1004 = vmatprep.subr.bf16.mxu0 %v1137_v6 }
 0x289   :  { %1005 = vmatpush3.bf16.msra.mxu0 %v1138_v7 }
 0x28a   :  { %1006 = vmatprep.subr.bf16.mxu0 %v1139_v8 }
 0x28d   :  { %1007 = vmatpush3.bf16.msra.mxu0 %v1140_v34 }
 0x28e   :  { %1008 = vmatprep.subr.bf16.mxu0 %v1141_v35 }
 0x291   :  { %1009 = vmatpush3.bf16.msra.mxu0 %v1142_v36 }
 0x292   :  { %1010 = vmatprep.subr.bf16.mxu0 %v1143_v37 }
 0x295   :  { %1011 = vmatpush3.bf16.msra.mxu0 %v1144_v38 }
 0x296   :  { %1012 = vmatprep.subr.bf16.mxu0 %v1145_v39 }
 0x299   :  { %1013 = vmatpush3.bf16.msra.mxu0 %v1146_v46 }
 0x33c   :  { %v664_v54 = vpop.f32.mrf.mxu0 }
 0x33d   :  { %v665_v55 = vadd.f32 %v664_v54, %v463_v44 }
 0x33e   :  { %v666_v56 = vpop.f32.mrf.mxu0 }
 0x33f   :  { %vm671_vm3 = vcmp.ge.f32.partialorder %v665_v55, 0.0  ;;  %v673_v57 = vmul.f32 0.2, %v665_v55  ;;  %v667_v58 = vadd.f32 %v666_v56, %v467_v45 }
 0x340   :  { %v668_v59 = vpop.f32.mrf.mxu0 }
 0x341   :  { %v675_v60 = vsel %vm671_vm3, %v665_v55, %v673_v57  ;;  %vm672_vm4 = vcmp.ge.f32.partialorder %v667_v58, 0.0  ;;  %v674_v61 = vmul.f32 0.2, %v667_v58 }
 0x342   :  { %v669_v62 = vpop.f32.mrf.mxu0  ;;  %v677_v63 = vmul.f32 %v675_v60, %v675_v60 }
 0x343   :  { %v676_v0 = vsel %vm672_vm4, %v667_v58, %v674_v61 }
 0x344   :  { %v678_v1 = vmul.f32 %v676_v0, %v676_v0  ;;  %v679_v5 = vpack.c.bf16 %v677_v63, %v677_v63 }
 0x346   :  { %v680_v2 = vpack.c.bf16 %v678_v1, %v678_v1 }
 0x348   :  { %713 = vmatprep.mubr.bf16.mxu1 %v680_v2 }
 0x349   :  { %714 = vmatmul.mubr.bf16.vlgmr.msra.gmra.mxu1 %v679_v5 }
 0x409   :  { %v715_v47 = vpop.f32.mrf.mxu1 }
 0x40a   :  { %v716_v48 = vadd.f32 1e-08, %v715_v47 }
 0x40b   :  { %v717_v49 = vpop.f32.mrf.mxu1 }
 0x40c   :  { %1153 = vrsqrt.f32 %v716_v48  ;;  %v718_v50 = vadd.f32 1e-08, %v717_v49 }
 0x40d   :  { %v719_v51 = vpop.f32.mrf.mxu1 }
 0x40e   :  { %1155 = vrsqrt.f32 %v718_v50 }
 0x40f   :  { %v720_v52 = vpop.f32.mrf.mxu1 }
 0x419   :  { %v1154_v53 = vpop.eup %1153 }
 0x41a   :  { %v724_v10 = vmul.f32 %v1154_v53, %v675_v60 }
 0x41b   :  { %v1156_v9 = vpop.eup %1155 }
 0x41c   :  { %v725_v11 = vmul.f32 %v1156_v9, %v676_v0  ;;  %v726_v13 = vpack.c.bf16 %v724_v10, %v724_v10 }
 0x41e   :  { %v727_v12 = vpack.c.bf16 %v725_v11, %v725_v11 }
 0x420   :  { %895 = vmatprep.mubr.bf16.mxu0 %v727_v12 }
 0x421   :  { %896 = vmatmul.mubr.bf16.vlgmr.msra.gmra.mxu0 %v726_v13 }
 0x4e1   :  { %v1014_v14 = vpop.f32.mrf.mxu0 }
 0x4e3   :  { %v1015_v16 = vpop.f32.mrf.mxu0 }
 0x4e4   :  { %v1016_v17 = vadd.f32 %v1015_v16, %v1014_v14 }
 0x4e5   :  { %v1017_v18 = vpop.f32.mrf.mxu0 }
 0x4e6   :  { %v898_v19 = vadd.f32 %v1016_v17, %v981_v15 }
 0x4e7   :  { %v1018_v20 = vpop.f32.mrf.mxu0 }
 0x4e8   :  { %1157 = vtanh.f32 %v898_v19 }
 0x4f5   :  { %v1158_v21 = vpop.eup %1157 }
 0x4f6   :  { %904 = vst [vmem:[%s1500_s8] sm:$0xff] %v1158_v21 }
 0x4f7   :  { %909 = vsyncpa [#allocation3], 1 }
 0x4f8   :  { %910 = vsyncpa [#allocation5], 1 }
 0x4f9   :  { %911 = vsyncpa [#allocation8], 1 }

</bundles_post_ra>
